<compile_context>
chip_gen: v5e
topology: v5e:2x2
jax: 0.10.0
libtpu: 0.0.40
codegen_flags: <defaults>
</compile_context>

<pallas_src>
import math

import jax
import jax.numpy as jnp
from jax.experimental import pallas as pl
from jax.experimental.pallas import tpu as pltpu

F_IN, F_HID, F_OUT = 10, 20, 1


def mlp_kernel(x_ref, w1t_ref, b1t_ref, w2_ref, b2_ref, o_ref):
    # x: (TB, F_IN). Layer 1 computed transposed so the hidden activations are
    # lane-dense:  h_t[f, b] = sum_k w1t[f, k] * x[b, k]  -> (F_HID, TB).
    h_t = jax.lax.dot_general(
        w1t_ref[...], x_ref[...],
        dimension_numbers=(((1,), (1,)), ((), ())),
        preferred_element_type=jnp.float32,
    )
    # Bias is a (F_HID, 1) column broadcast along lanes; ReLU on dense vregs.
    h_t = jnp.maximum(h_t + b1t_ref[...], 0.0)
    # Layer 2: (1, F_HID) @ (F_HID, TB) -> (1, TB), born lane-dense.
    out_t = jnp.dot(w2_ref[...], h_t, preferred_element_type=jnp.float32)
    out_t = out_t + b2_ref[0]
    o_ref[...] = out_t.reshape(o_ref.shape).astype(o_ref.dtype)


def _round_up(n, m):
    return ((n + m - 1) // m) * m


def mlp_forward(x, w1t, b1t, w2, b2, *, batch_tile=4096):
    """x: [B, 10]; w1t: [20, 10]; b1t: [20, 1]; w2: [1, 20]; b2: [1]."""
    B = x.shape[0]
    vmem = pltpu.MemorySpace.VMEM
    smem = pltpu.MemorySpace.SMEM

    # Padded-VMEM estimate for the no-grid fast path: x rows lane-pad 10->128
    # (512 B/row); the (1, B) output sublane-pads to (8, B) (32 B/row).
    fast_path_bytes = B * (128 * 4 + 8 * 4) + 64 * 1024
    if B <= batch_tile and fast_path_bytes < 8 * 1024 * 1024:
        out = pl.pallas_call(
            mlp_kernel,
            out_shape=jax.ShapeDtypeStruct((1, B), jnp.float32),
            in_specs=[pl.BlockSpec(memory_space=vmem)] * 4
                     + [pl.BlockSpec(memory_space=smem)],
            out_specs=pl.BlockSpec(memory_space=vmem),
        )(x, w1t, b1t, w2, b2)
        return out.reshape(B, F_OUT)

    # Large batch: stream x over a 1-D batch grid; weights/biases stay resident
    # (index_map always (0, 0)).  Keep >= 2 grid steps for v7x megacore.
    tb = min(batch_tile, _round_up(-(-B // 2), 128))
    tb = max(tb, 128)
    grid_len = pl.cdiv(B, tb)

    out = pl.pallas_call(
        mlp_kernel,
        out_shape=jax.ShapeDtypeStruct((grid_len, 1, tb), jnp.float32),
        grid=(grid_len,),
        in_specs=[
            pl.BlockSpec((tb, F_IN), lambda i: (i, 0)),        # x tile streams
            pl.BlockSpec((F_HID, F_IN), lambda i: (0, 0)),     # w1^T resident
            pl.BlockSpec((F_HID, 1), lambda i: (0, 0)),        # b1 resident
            pl.BlockSpec((1, F_HID), lambda i: (0, 0)),        # w2 resident
            pl.BlockSpec((1,), lambda i: (0,), memory_space=smem),  # b2 scalar
        ],
        out_specs=pl.BlockSpec((1, 1, tb), lambda i: (i, 0, 0)),
        compiler_params=pltpu.CompilerParams(
            dimension_semantics=("parallel",),
        ),
    )(x, w1t, b1t, w2, b2)
    # (G, 1, tb) is contiguous; flatten and drop the padded tail rows (garbage
    # produced from out-of-bounds input rows is never used).
    return out.reshape(-1)[:B].reshape(B, F_OUT)


def xavier_uniform(key, fan_in, fan_out, shape, dtype=jnp.float32):
    # Matches torch.nn.init.xavier_uniform_ (gain=1.0).
    bound = math.sqrt(6.0 / (fan_in + fan_out))
    return jax.random.uniform(key, shape, dtype=dtype, minval=-bound, maxval=bound)


def reference(x, w1t, b1t, w2, b2):
    h = jnp.maximum(x @ w1t.T + b1t.reshape(1, -1), 0.0)
    return h @ w2.T + b2.reshape(1, 1)


if __name__ == "__main__":
    key = jax.random.PRNGKey(0)
    k_x, k_xl, k_w1, k_w2 = jax.random.split(key, 4)

    # Parameters mirroring MyModel._init_weights (xavier_uniform weights, zero
    # biases), stored in the PyTorch (out_features, in_features) layout.
    w1t = xavier_uniform(k_w1, F_IN, F_HID, (F_HID, F_IN))    # [20, 10]
    b1t = jnp.zeros((F_HID, 1), dtype=jnp.float32)            # [20, 1]
    w2 = xavier_uniform(k_w2, F_HID, F_OUT, (F_OUT, F_HID))   # [1, 20]
    b2 = jnp.zeros((F_OUT,), dtype=jnp.float32)                # [1]

    # --- Small-batch path (no grid / no pipelining) ---
    B = 2
    x = jax.random.normal(k_x, (B, F_IN), dtype=jnp.float32)
    out = jax.block_until_ready(mlp_forward(x, w1t, b1t, w2, b2))
    ref = reference(x, w1t, b1t, w2, b2)
    assert out.shape == (B, F_OUT)
    assert jnp.allclose(out, ref, atol=1e-5, rtol=1e-5)

    # --- Large-batch path (batch-tiled grid, lane-dense (G,1,TB) output slab,
    #     B not a multiple of the tile -> exercises the padded tail) ---
    BL = 5000
    xl = jax.random.normal(k_xl, (BL, F_IN), dtype=jnp.float32)
    out_l = jax.block_until_ready(mlp_forward(xl, w1t, b1t, w2, b2, batch_tile=4096))
    ref_l = reference(xl, w1t, b1t, w2, b2)
    assert out_l.shape == (BL, F_OUT)
    assert jnp.allclose(out_l, ref_l, atol=1e-5, rtol=1e-5)

    print("KERNEL_OK")
</pallas_src>

<mosaic_0001>
module attributes {stable_mosaic.version = 11 : i64} {
  func.func @mlp_kernel(%arg0: memref<2x10xf32, #tpu.memory_space<vmem>>, %arg1: memref<20x10xf32, #tpu.memory_space<vmem>>, %arg2: memref<20x1xf32, #tpu.memory_space<vmem>>, %arg3: memref<1x20xf32, #tpu.memory_space<vmem>>, %arg4: memref<1xf32, #tpu.memory_space<smem>>, %arg5: memref<1x2xf32, #tpu.memory_space<vmem>>) attributes {dimension_semantics = [], scalar_prefetch = 0 : i64, scratch_operands = 0 : i64, tpu.core_type = #tpu.core_type<tc>} {
    %c0 = arith.constant 0 : index
    %c0_0 = arith.constant 0 : index
    %0 = vector.load %arg1[%c0, %c0_0] : memref<20x10xf32, #tpu.memory_space<vmem>>, vector<20x10xf32>
    %c0_1 = arith.constant 0 : index
    %c0_2 = arith.constant 0 : index
    %1 = vector.load %arg0[%c0_1, %c0_2] : memref<2x10xf32, #tpu.memory_space<vmem>>, vector<2x10xf32>
    %cst = arith.constant dense<0.000000e+00> : vector<20x2xf32>
    %2 = tpu.matmul %0, %1, %cst {dimension_numbers = #tpu.dot_dimension_numbers<[1], [1], [0], [0], [0, 0, 1, 0], [], []>} : vector<20x10xf32>, vector<2x10xf32>, vector<20x2xf32> -> vector<20x2xf32>
    %c0_3 = arith.constant 0 : index
    %c0_4 = arith.constant 0 : index
    %3 = vector.load %arg2[%c0_3, %c0_4] : memref<20x1xf32, #tpu.memory_space<vmem>>, vector<20x1xf32>
    %4 = vector.broadcast %3 : vector<20x1xf32> to vector<20x2xf32>
    %5 = arith.addf %2, %4 : vector<20x2xf32>
    %cst_5 = arith.constant 0.000000e+00 : f32
    %6 = vector.broadcast %cst_5 : f32 to vector<20x2xf32>
    %7 = arith.maximumf %5, %6 : vector<20x2xf32>
    %c0_6 = arith.constant 0 : index
    %c0_7 = arith.constant 0 : index
    %8 = vector.load %arg3[%c0_6, %c0_7] : memref<1x20xf32, #tpu.memory_space<vmem>>, vector<1x20xf32>
    %cst_8 = arith.constant dense<0.000000e+00> : vector<1x2xf32>
    %9 = tpu.matmul %8, %7, %cst_8 {dimension_numbers = #tpu.dot_dimension_numbers<[1], [0], [0], [1], [0, 0, 1, 1], [], []>} : vector<1x20xf32>, vector<20x2xf32>, vector<1x2xf32> -> vector<1x2xf32>
    %c0_9 = arith.constant 0 : index
    %10 = memref.load %arg4[%c0_9] : memref<1xf32, #tpu.memory_space<smem>>
    %11 = vector.broadcast %10 : f32 to vector<1x2xf32>
    %12 = arith.addf %9, %11 : vector<1x2xf32>
    %c0_10 = arith.constant 0 : index
    %c0_11 = arith.constant 0 : index
    %13 = vector.load %arg5[%c0_10, %c0_11] : memref<1x2xf32, #tpu.memory_space<vmem>>, vector<1x2xf32>
    tpu.vector_store %arg5[%c0_10, %c0_11], %12 {strides = array<i32>} : memref<1x2xf32, #tpu.memory_space<vmem>>, vector<1x2xf32>,
    return
  }
}

</mosaic_0001>

<bundles_post_ra>
// kernel: tpu_custom_call.1
= control target key start
LH: loop header
LB: loop body
LE: loop exit
PB: predicated region body
PF: predicated region fallthrough
CT: control target
= control target key end

     0   :  { %vm44_vm0 = vcmask 80896   ;;  %v173_v4 = vmov 0   ;;  %s241_s0 = inlined_call_operand.vmem [shape: f32[2,10], index: 0, kind: input, shape index: {}]   ;;  %s242_s1 = inlined_call_operand.vmem [shape: f32[20,10], index: 1, kind: input, shape index: {}]   ;;  %s243_s2 = inlined_call_operand.vmem [shape: f32[20,1], index: 2, kind: input, shape index: {}]   ;;  %s244_s3 = inlined_call_operand.vmem [shape: f32[1,20], index: 3, kind: input, shape index: {}]   ;;  %s245_s4 = inlined_call_operand.<no memory space> [shape: f32[1], index: 4, kind: input, shape index: {}]   ;;  %s246_s5 = inlined_call_operand.hbm [shape: f32[1,2], index: 5, kind: output, shape index: {}]  }
   0x1   :  { %v25_v0 = vld [vmem:[%s241_s0] sm:$0x3]  ;;  %v23_v1 = vld [vmem:[%s242_s1 + $0x8] sm:$0xff]  ;;  %v24_v2 = vld [vmem:[%s242_s1 + $0x10] sm:$0xf]  ;;  %145 = vset.pattern.permute.xlu0 %v173_v4 }
   0x2   :  { %141 = vmatpush.xpose.msk.msra.mxu2 %vm44_vm0, %v25_v0  ;;  %142 = vmatpush.xpose.msk.msra.mxu3 %vm44_vm0, %v25_v0  ;;  %v28_v3 = vld [vmem:[%s243_s2 + $0x10] sm:$0xf]  ;;  %v22_v5 = vld [vmem:[%s242_s1] sm:$0xff] }
   0x3   :  { %135 = vmatpush.xpose.msk.msra.mxu0 %vm44_vm0, %v25_v0  ;;  %v26_v6 = vld [vmem:[%s243_s2] sm:$0xff] }
   0x4   :  { %11 = vsyncpa [#allocation4], 0  ;;  %41 = vperm.xlu0 %145, %v28_v3   ;;  %146 = vset.pattern.permute.xlu1 %v173_v4  ;;  %v27_v7 = vld [vmem:[%s243_s2 + $0x8] sm:$0xff]  ;;  %vm93_vm1 = vcmask 1043456   ;;  %v86_v20 = vld [vmem:[%s244_s3] sm:$0x1]  ;;  %v88_v21 = vstv %s245_s4 }
   0x5   :  { %137 = vmatmul.msk.f32.vlgmr.msra.gmra.mxu2 %vm44_vm0, %v23_v1  ;;  %138 = vmatmul.msk.f32.vlgmr.msra.gmra.mxu3 %vm44_vm0, %v24_v2  ;;  %vm89_vm2 = vcmask 162816   ;;  %s174_s8 = smov [#allocation3]   ;;  %s126_s12 = sshll.u32 %s246_s5, 4  ;;  %vm117_vm3 = vcmask 8192   ;;  %s127_s12 = int_to_ptr.hbm [resolvable:$true] %s126_s12 }
   0x6   :  { %136 = vmatmul.msk.f32.vlgmr.msra.gmra.mxu0 %vm44_vm0, %v22_v5  ;;  %31 = vperm.xlu1 %146, %v26_v6   ;;  %s124_s9 = sshll.u32 %s174_s8, 4  ;;  %s125_s9 = int_to_ptr.vmem [resolvable:$true] %s124_s9 }
   0xc   :  { %36 = vperm.xlu0 %145, %v27_v7  }
  0x76   :  { %v42_v8 = vpop.permute.xlu0 %41 }
  0x78   :  { %v32_v9 = vpop.permute.xlu1 %31 }
  0x7e   :  { %v37_v11 = vpop.permute.xlu0 %36 }
  0x83   :  { %v74_v10 = vpop.f32.mrf.mxu0 }
  0x84   :  { %v75_v16 = vadd.f32 %v74_v10, %v32_v9 }
  0x86   :  { %v83_v19 = vmax.f32 %v75_v16, 0.0 }
  0x88   :  { %v77_v12 = vpop.f32.mrf.mxu2  ;;  %v80_v13 = vpop.f32.mrf.mxu3 }
  0x89   :  { %v78_v14 = vadd.f32 %v77_v12, %v37_v11  ;;  %v81_v15 = vadd.f32 %v80_v13, %v42_v8 }
  0x8b   :  { %v85_v17 = vmax.f32 %v81_v15, 0.0  ;;  %v84_v18 = vmax.f32 %v78_v14, 0.0 }
  0x8d   :  { %139 = vmatpush.msk.msra.mxu1 %vm93_vm1, %v85_v17 }
  0x8f   :  { %111 = vmatpush.msra.mxu1 %v84_v18 }
  0x91   :  { %112 = vmatpush.msra.mxu1 %v83_v19 }
  0x92   :  { %140 = vmatmul.msk.f32.vlgmr.msra.gmra.mxu1 %vm89_vm2, %v86_v20 }
 0x10f   :  { %v114_v22 = vpop.f32.mrf.mxu1 }
 0x110   :  { %v115_v23 = vadd.f32 %v114_v22, %v88_v21 }
 0x112   :  { %118 = vst.msk [vmem:[#allocation3] sm:$0x1] %vm117_vm3, %v115_v23 }
 0x113   :  { %129 = dma.vmem_to_hbm [thread:$0]  %s125_s9, 16, %s127_s12, [#allocation4]  }
 0x114   :  { %171 = dma.done.wait [#allocation4], 16  }
 0x115   :  { %172 = vsyncadd [#allocation4], 4294967280 }
 0x116   :  { %134 = vsyncpa [#allocation4], 1 }

</bundles_post_ra>
